<compile_context>
chip_gen: v7x
topology: tpu7x:2x2x1
jax: 0.10.0
libtpu: 0.0.40
codegen_flags: <defaults>
</compile_context>

<pallas_src>
import jax
import jax.numpy as jnp
from jax.experimental import pallas as pl
from jax.experimental.pallas import tpu as pltpu


# ----------------------------------------------------------------------------
# fused decoder step: embedding gather + L-layer LSTM single step, one kernel call
#   tok_ref : SMEM (B,)   int32 token ids
#   emb_ref : VMEM (V,E)  f32 embedding table
#   h0/c0   : VMEM (L,B,H) f32 previous state
#   w_ref   : VMEM (L,D+H,4H) bf16 packed [W_ih ; W_hh], gate order i|f|g|o
#   b_ref   : VMEM (L,1,4H)   f32 combined bias (bias_ih + bias_hh)
#   x_cat   : VMEM scratch (B, D+H) f32 — the [x | h] matmul input
# ----------------------------------------------------------------------------
def _decoder_kernel(tok_ref, emb_ref, h0_ref, c0_ref, w_ref, b_ref,
                    h_out_ref, c_out_ref, x_cat):
    L, B, H = h0_ref.shape
    E = emb_ref.shape[1]
    DH = x_cat.shape[1]
    D = DH - H

    # zero the concat buffer so padded columns ([E:D] for layer 0, [H:D] for l>0)
    # are exactly zero; the matching W_cat rows are zero-padded as well.
    x_cat[...] = jnp.zeros_like(x_cat)

    # fused embedding gather (nn.Dropout = identity in eval / deterministic forward)
    # TODO(synk): training-mode dropout (pltpu.prng_*) not implemented.
    for bi in range(B):
        tok = tok_ref[bi]
        x_cat[bi:bi + 1, 0:E] = emb_ref[pl.ds(tok, 1), :]        # (1, E) row

    # layer recurrence, fully unrolled (L is small & static)
    for l in range(L):
        x_cat[:, D:DH] = h0_ref[l]                               # hidden-side input
        # single packed matmul: [x|h](bf16) @ W_cat(bf16) -> f32 accumulation
        gates = (jnp.dot(x_cat[...].astype(jnp.bfloat16), w_ref[l],
                         preferred_element_type=jnp.float32)
                 + b_ref[l])                                     # (B,4H), i|f|g|o

        i_g = jax.nn.sigmoid(gates[:, 0 * H:1 * H])
        f_g = jax.nn.sigmoid(gates[:, 1 * H:2 * H])
        g_g = jnp.tanh(gates[:, 2 * H:3 * H])
        o_g = jax.nn.sigmoid(gates[:, 3 * H:4 * H])

        c_new = f_g * c0_ref[l] + i_g * g_g                      # f32 elementwise
        h_new = o_g * jnp.tanh(c_new)

        h_out_ref[l] = h_new
        c_out_ref[l] = c_new

        if l + 1 < L:
            # next layer's x-input = this layer's hidden (inter-layer dropout = id)
            x_cat[:, 0:H] = h_new
            if H < D:                                            # keep padding zero
                x_cat[:, H:D] = jnp.zeros((B, D - H), x_cat.dtype)


def lstm_decoder_step(tokens, emb, h0, c0, w_cat, b):
    L, B, H = h0.shape
    DH = w_cat.shape[1]
    return pl.pallas_call(
        _decoder_kernel,
        out_shape=(jax.ShapeDtypeStruct((L, B, H), jnp.float32),
                   jax.ShapeDtypeStruct((L, B, H), jnp.float32)),
        in_specs=[
            pl.BlockSpec(memory_space=pltpu.MemorySpace.SMEM),   # tokens (B,)
            pl.BlockSpec(memory_space=pltpu.MemorySpace.VMEM),   # emb table (V,E)
            pl.BlockSpec(memory_space=pltpu.MemorySpace.VMEM),   # h0 (L,B,H)
            pl.BlockSpec(memory_space=pltpu.MemorySpace.VMEM),   # c0 (L,B,H)
            pl.BlockSpec(memory_space=pltpu.MemorySpace.VMEM),   # W_cat (L,D+H,4H) bf16
            pl.BlockSpec(memory_space=pltpu.MemorySpace.VMEM),   # bias (L,1,4H)
        ],
        out_specs=(pl.BlockSpec(memory_space=pltpu.MemorySpace.VMEM),
                   pl.BlockSpec(memory_space=pltpu.MemorySpace.VMEM)),
        scratch_shapes=[pltpu.VMEM((B, DH), jnp.float32)],       # [x|h] concat buffer
        # reuse the state buffers across decode steps: h0 -> h_out, c0 -> c_out
        # (inputs 2 and 3 of the call; reads happen before the output writeback)
        input_output_aliases={2: 0, 3: 1},
    )(tokens, emb, h0, c0, w_cat, b)


# ----------------------------------------------------------------------------
# parameter packing: PyTorch-layout LSTM weights -> one packed bf16 tensor per stack
#   weight_ih_l{k}: (4H, in_dim), weight_hh_l{k}: (4H, H), bias_ih/bias_hh: (4H,)
#   -> W_cat (L, D+H, 4H) bf16 with D = round_up(max(E, H), 128); rows [in_dim:D]
#      zero-padded so padded x columns contribute exactly zero.
#   -> b (L, 1, 4H) f32  (bias_ih + bias_hh, exact for LSTM)
# ----------------------------------------------------------------------------
def pack_lstm_params(layers, emb_dim, hid_dim):
    H = hid_dim
    D = ((max(emb_dim, hid_dim) + 127) // 128) * 128
    w_l, b_l = [], []
    for lp in layers:
        w_ih = lp["weight_ih"].T                                 # (in_dim, 4H)
        w_ih = jnp.pad(w_ih, ((0, D - w_ih.shape[0]), (0, 0)))   # zero rows -> exact
        w_hh = lp["weight_hh"].T                                 # (H, 4H)
        w_cat = jnp.concatenate([w_ih, w_hh], axis=0)            # (D+H, 4H)
        w_l.append(w_cat.astype(jnp.bfloat16))
        b_l.append((lp["bias_ih"] + lp["bias_hh"]).astype(jnp.float32)[None, :])
    return jnp.stack(w_l), jnp.stack(b_l)


# ----------------------------------------------------------------------------
# Decoder.forward equivalent (whole forward jitted; ONE pallas_call per step)
# ----------------------------------------------------------------------------
@jax.jit
def decoder_forward(emb, w_cat, b, tokens, hidden):
    h0, c0 = hidden                                              # each (L, B, H)
    h_new, c_new = lstm_decoder_step(tokens, emb, h0, c0, w_cat, b)
    output = h_new[-1][None]                                     # (1, B, H): top-layer h
    return output, (h_new, c_new)


# ----------------------------------------------------------------------------
# pure-jnp fp32 reference (per-gate, unpacked weights) for correctness check
# ----------------------------------------------------------------------------
def ref_decoder_forward(emb, layers, tokens, hidden):
    h0, c0 = hidden
    x = emb[tokens].astype(jnp.float32)
    hs, cs = [], []
    for l, lp in enumerate(layers):
        gates = (x @ lp["weight_ih"].T + lp["bias_ih"]
                 + h0[l] @ lp["weight_hh"].T + lp["bias_hh"])
        i, f, g, o = jnp.split(gates, 4, axis=-1)
        i, f, o = jax.nn.sigmoid(i), jax.nn.sigmoid(f), jax.nn.sigmoid(o)
        g = jnp.tanh(g)
        c2 = f * c0[l] + i * g
        h2 = o * jnp.tanh(c2)
        hs.append(h2)
        cs.append(c2)
        x = h2                                                   # inter-layer dropout: id (eval)
    h_new, c_new = jnp.stack(hs), jnp.stack(cs)
    return h_new[-1][None], (h_new, c_new)


# ----------------------------------------------------------------------------
if __name__ == "__main__":
    # small but lane/sublane-aligned shapes (B multiple of 8, H multiple of 128).
    # note for v7x: growing B (more beams/sequences) is the way to use the 2nd TC.
    B, EMB_DIM, HID_DIM, N_LAYERS = 8, 128, 128, 2
    N_TOKENS = 64

    key = jax.random.PRNGKey(0)
    k_emb, k_lay, k_tok, k_h, k_c = jax.random.split(key, 5)

    emb = jax.random.normal(k_emb, (N_TOKENS, EMB_DIM), jnp.float32) * 0.1
    layers = []
    for l, kl in enumerate(jax.random.split(k_lay, N_LAYERS)):
        in_dim = EMB_DIM if l == 0 else HID_DIM
        ks = jax.random.split(kl, 4)
        layers.append(dict(
            weight_ih=jax.random.normal(ks[0], (4 * HID_DIM, in_dim), jnp.float32) * 0.1,
            weight_hh=jax.random.normal(ks[1], (4 * HID_DIM, HID_DIM), jnp.float32) * 0.1,
            bias_ih=jax.random.normal(ks[2], (4 * HID_DIM,), jnp.float32) * 0.1,
            bias_hh=jax.random.normal(ks[3], (4 * HID_DIM,), jnp.float32) * 0.1,
        ))

    tokens = jax.random.randint(k_tok, (B,), 0, N_TOKENS, dtype=jnp.int32)
    h0 = jax.random.normal(k_h, (N_LAYERS, B, HID_DIM), jnp.float32)
    c0 = jax.random.normal(k_c, (N_LAYERS, B, HID_DIM), jnp.float32)

    w_cat, b = pack_lstm_params(layers, EMB_DIM, HID_DIM)

    out, (h1, c1) = decoder_forward(emb, w_cat, b, tokens, (h0, c0))
    out, h1, c1 = jax.block_until_ready((out, h1, c1))
    assert out.shape == (1, B, HID_DIM), out.shape
    assert h1.shape == (N_LAYERS, B, HID_DIM) and c1.shape == (N_LAYERS, B, HID_DIM)

    ref_out, (ref_h, ref_c) = ref_decoder_forward(emb, layers, tokens, (h0, c0))
    ref_out, ref_h, ref_c = jax.block_until_ready((ref_out, ref_h, ref_c))
    # bf16 weights with f32 accumulation vs. fp32 reference -> relaxed tolerances.
    TOL = dict(rtol=3e-2, atol=3e-2)
    assert jnp.allclose(out, ref_out, **TOL), "output mismatch vs reference"
    assert jnp.allclose(h1, ref_h, **TOL), "h mismatch vs reference"
    assert jnp.allclose(c1, ref_c, **TOL), "c mismatch vs reference"

    print("KERNEL_OK")
</pallas_src>

<mosaic_0001>
module attributes {stable_mosaic.version = 11 : i64} {
  func.func @_decoder_kernel(%arg0: memref<8xi32, #tpu.memory_space<smem>>, %arg1: memref<64x128xf32, #tpu.memory_space<vmem>>, %arg2: memref<2x8x128xf32, #tpu.memory_space<vmem>>, %arg3: memref<2x8x128xf32, #tpu.memory_space<vmem>>, %arg4: memref<2x256x512xbf16, #tpu.memory_space<vmem>>, %arg5: memref<2x1x512xf32, #tpu.memory_space<vmem>>, %arg6: memref<2x8x128xf32, #tpu.memory_space<vmem>>, %arg7: memref<2x8x128xf32, #tpu.memory_space<vmem>>, %arg8: memref<8x256xf32, #tpu.memory_space<vmem>>) attributes {dimension_semantics = [], scalar_prefetch = 0 : i64, scratch_operands = 1 : i64, tpu.core_type = #tpu.core_type<tc>} {
    %cst = arith.constant 0.000000e+00 : f32
    %0 = vector.broadcast %cst : f32 to vector<8x256xf32>
    %c0 = arith.constant 0 : index
    %c0_0 = arith.constant 0 : index
    %1 = vector.load %arg8[%c0, %c0_0] : memref<8x256xf32, #tpu.memory_space<vmem>>, vector<8x256xf32>
    tpu.vector_store %arg8[%c0, %c0_0], %0 {strides = array<i32>} : memref<8x256xf32, #tpu.memory_space<vmem>>, vector<8x256xf32>,
    %c0_1 = arith.constant 0 : index
    %2 = memref.load %arg0[%c0_1] : memref<8xi32, #tpu.memory_space<smem>>
    %3 = arith.index_cast %2 : i32 to index
    %c0_2 = arith.constant 0 : index
    %4 = vector.load %arg1[%3, %c0_2] : memref<64x128xf32, #tpu.memory_space<vmem>>, vector<1x128xf32>
    %c0_3 = arith.constant 0 : index
    %c0_4 = arith.constant 0 : index
    %5 = vector.load %arg8[%c0_3, %c0_4] : memref<8x256xf32, #tpu.memory_space<vmem>>, vector<1x128xf32>
    tpu.vector_store %arg8[%c0_3, %c0_4], %4 {strides = array<i32>} : memref<8x256xf32, #tpu.memory_space<vmem>>, vector<1x128xf32>,
    %c1 = arith.constant 1 : index
    %6 = memref.load %arg0[%c1] : memref<8xi32, #tpu.memory_space<smem>>
    %7 = arith.index_cast %6 : i32 to index
    %c0_5 = arith.constant 0 : index
    %8 = vector.load %arg1[%7, %c0_5] : memref<64x128xf32, #tpu.memory_space<vmem>>, vector<1x128xf32>
    %c1_6 = arith.constant 1 : index
    %c0_7 = arith.constant 0 : index
    %9 = vector.load %arg8[%c1_6, %c0_7] : memref<8x256xf32, #tpu.memory_space<vmem>>, vector<1x128xf32>
    tpu.vector_store %arg8[%c1_6, %c0_7], %8 {strides = array<i32>} : memref<8x256xf32, #tpu.memory_space<vmem>>, vector<1x128xf32>,
    %c2 = arith.constant 2 : index
    %10 = memref.load %arg0[%c2] : memref<8xi32, #tpu.memory_space<smem>>
    %11 = arith.index_cast %10 : i32 to index
    %c0_8 = arith.constant 0 : index
    %12 = vector.load %arg1[%11, %c0_8] : memref<64x128xf32, #tpu.memory_space<vmem>>, vector<1x128xf32>
    %c2_9 = arith.constant 2 : index
    %c0_10 = arith.constant 0 : index
    %13 = vector.load %arg8[%c2_9, %c0_10] : memref<8x256xf32, #tpu.memory_space<vmem>>, vector<1x128xf32>
    tpu.vector_store %arg8[%c2_9, %c0_10], %12 {strides = array<i32>} : memref<8x256xf32, #tpu.memory_space<vmem>>, vector<1x128xf32>,
    %c3 = arith.constant 3 : index
    %14 = memref.load %arg0[%c3] : memref<8xi32, #tpu.memory_space<smem>>
    %15 = arith.index_cast %14 : i32 to index
    %c0_11 = arith.constant 0 : index
    %16 = vector.load %arg1[%15, %c0_11] : memref<64x128xf32, #tpu.memory_space<vmem>>, vector<1x128xf32>
    %c3_12 = arith.constant 3 : index
    %c0_13 = arith.constant 0 : index
    %17 = vector.load %arg8[%c3_12, %c0_13] : memref<8x256xf32, #tpu.memory_space<vmem>>, vector<1x128xf32>
    tpu.vector_store %arg8[%c3_12, %c0_13], %16 {strides = array<i32>} : memref<8x256xf32, #tpu.memory_space<vmem>>, vector<1x128xf32>,
    %c4 = arith.constant 4 : index
    %18 = memref.load %arg0[%c4] : memref<8xi32, #tpu.memory_space<smem>>
    %19 = arith.index_cast %18 : i32 to index
    %c0_14 = arith.constant 0 : index
    %20 = vector.load %arg1[%19, %c0_14] : memref<64x128xf32, #tpu.memory_space<vmem>>, vector<1x128xf32>
    %c4_15 = arith.constant 4 : index
    %c0_16 = arith.constant 0 : index
    %21 = vector.load %arg8[%c4_15, %c0_16] : memref<8x256xf32, #tpu.memory_space<vmem>>, vector<1x128xf32>
    tpu.vector_store %arg8[%c4_15, %c0_16], %20 {strides = array<i32>} : memref<8x256xf32, #tpu.memory_space<vmem>>, vector<1x128xf32>,
    %c5 = arith.constant 5 : index
    %22 = memref.load %arg0[%c5] : memref<8xi32, #tpu.memory_space<smem>>
    %23 = arith.index_cast %22 : i32 to index
    %c0_17 = arith.constant 0 : index
    %24 = vector.load %arg1[%23, %c0_17] : memref<64x128xf32, #tpu.memory_space<vmem>>, vector<1x128xf32>
    %c5_18 = arith.constant 5 : index
    %c0_19 = arith.constant 0 : index
    %25 = vector.load %arg8[%c5_18, %c0_19] : memref<8x256xf32, #tpu.memory_space<vmem>>, vector<1x128xf32>
    tpu.vector_store %arg8[%c5_18, %c0_19], %24 {strides = array<i32>} : memref<8x256xf32, #tpu.memory_space<vmem>>, vector<1x128xf32>,
    %c6 = arith.constant 6 : index
    %26 = memref.load %arg0[%c6] : memref<8xi32, #tpu.memory_space<smem>>
    %27 = arith.index_cast %26 : i32 to index
    %c0_20 = arith.constant 0 : index
    %28 = vector.load %arg1[%27, %c0_20] : memref<64x128xf32, #tpu.memory_space<vmem>>, vector<1x128xf32>
    %c6_21 = arith.constant 6 : index
    %c0_22 = arith.constant 0 : index
    %29 = vector.load %arg8[%c6_21, %c0_22] : memref<8x256xf32, #tpu.memory_space<vmem>>, vector<1x128xf32>
    tpu.vector_store %arg8[%c6_21, %c0_22], %28 {strides = array<i32>} : memref<8x256xf32, #tpu.memory_space<vmem>>, vector<1x128xf32>,
    %c7 = arith.constant 7 : index
    %30 = memref.load %arg0[%c7] : memref<8xi32, #tpu.memory_space<smem>>
    %31 = arith.index_cast %30 : i32 to index
    %c0_23 = arith.constant 0 : index
    %32 = vector.load %arg1[%31, %c0_23] : memref<64x128xf32, #tpu.memory_space<vmem>>, vector<1x128xf32>
    %c7_24 = arith.constant 7 : index
    %c0_25 = arith.constant 0 : index
    %33 = vector.load %arg8[%c7_24, %c0_25] : memref<8x256xf32, #tpu.memory_space<vmem>>, vector<1x128xf32>
    tpu.vector_store %arg8[%c7_24, %c0_25], %32 {strides = array<i32>} : memref<8x256xf32, #tpu.memory_space<vmem>>, vector<1x128xf32>,
    %c0_26 = arith.constant 0 : index
    %c0_27 = arith.constant 0 : index
    %c0_28 = arith.constant 0 : index
    %34 = vector.load %arg2[%c0_26, %c0_27, %c0_28] : memref<2x8x128xf32, #tpu.memory_space<vmem>>, vector<1x8x128xf32>
    %35 = vector.shape_cast %34 : vector<1x8x128xf32> to vector<8x128xf32>
    %c0_29 = arith.constant 0 : index
    %c128 = arith.constant 128 : index
    %36 = vector.load %arg8[%c0_29, %c128] : memref<8x256xf32, #tpu.memory_space<vmem>>, vector<8x128xf32>
    tpu.vector_store %arg8[%c0_29, %c128], %35 {strides = array<i32>} : memref<8x256xf32, #tpu.memory_space<vmem>>, vector<8x128xf32>,
    %c0_30 = arith.constant 0 : index
    %c0_31 = arith.constant 0 : index
    %37 = vector.load %arg8[%c0_30, %c0_31] : memref<8x256xf32, #tpu.memory_space<vmem>>, vector<8x256xf32>
    %38 = arith.truncf %37 : vector<8x256xf32> to vector<8x256xbf16>
    %c0_32 = arith.constant 0 : index
    %c0_33 = arith.constant 0 : index
    %c0_34 = arith.constant 0 : index
    %39 = vector.load %arg4[%c0_32, %c0_33, %c0_34] : memref<2x256x512xbf16, #tpu.memory_space<vmem>>, vector<1x256x512xbf16>
    %40 = vector.shape_cast %39 : vector<1x256x512xbf16> to vector<256x512xbf16>
    %cst_35 = arith.constant dense<0.000000e+00> : vector<8x512xf32>
    %41 = tpu.matmul %38, %40, %cst_35 {dimension_numbers = #tpu.dot_dimension_numbers<[1], [0], [0], [1], [0, 0, 1, 1], [], []>} : vector<8x256xbf16>, vector<256x512xbf16>, vector<8x512xf32> -> vector<8x512xf32>
    %c0_36 = arith.constant 0 : index
    %c0_37 = arith.constant 0 : index
    %c0_38 = arith.constant 0 : index
    %42 = vector.load %arg5[%c0_36, %c0_37, %c0_38] : memref<2x1x512xf32, #tpu.memory_space<vmem>>, vector<1x1x512xf32>
    %43 = vector.shape_cast %42 : vector<1x1x512xf32> to vector<1x512xf32>
    %44 = vector.broadcast %43 : vector<1x512xf32> to vector<8x512xf32>
    %45 = arith.addf %41, %44 : vector<8x512xf32>
    %46 = vector.extract_strided_slice %45 {offsets = [0, 0], sizes = [8, 128], strides = [1, 1]} : vector<8x512xf32> to vector<8x128xf32>
    %47 = arith.negf %46 : vector<8x128xf32>
    %48 = math.exp %47 : vector<8x128xf32>
    %cst_39 = arith.constant 1.000000e+00 : f32
    %49 = vector.broadcast %cst_39 : f32 to vector<8x128xf32>
    %50 = arith.addf %49, %48 : vector<8x128xf32>
    %51 = arith.divf %49, %50 : vector<8x128xf32>
    %52 = vector.extract_strided_slice %45 {offsets = [0, 128], sizes = [8, 128], strides = [1, 1]} : vector<8x512xf32> to vector<8x128xf32>
    %53 = arith.negf %52 : vector<8x128xf32>
    %54 = math.exp %53 : vector<8x128xf32>
    %cst_40 = arith.constant 1.000000e+00 : f32
    %55 = vector.broadcast %cst_40 : f32 to vector<8x128xf32>
    %56 = arith.addf %55, %54 : vector<8x128xf32>
    %57 = arith.divf %55, %56 : vector<8x128xf32>
    %58 = vector.extract_strided_slice %45 {offsets = [0, 256], sizes = [8, 128], strides = [1, 1]} : vector<8x512xf32> to vector<8x128xf32>
    %59 = math.tanh %58 : vector<8x128xf32>
    %60 = vector.extract_strided_slice %45 {offsets = [0, 384], sizes = [8, 128], strides = [1, 1]} : vector<8x512xf32> to vector<8x128xf32>
    %61 = arith.negf %60 : vector<8x128xf32>
    %62 = math.exp %61 : vector<8x128xf32>
    %cst_41 = arith.constant 1.000000e+00 : f32
    %63 = vector.broadcast %cst_41 : f32 to vector<8x128xf32>
    %64 = arith.addf %63, %62 : vector<8x128xf32>
    %65 = arith.divf %63, %64 : vector<8x128xf32>
    %c0_42 = arith.constant 0 : index
    %c0_43 = arith.constant 0 : index
    %c0_44 = arith.constant 0 : index
    %66 = vector.load %arg3[%c0_42, %c0_43, %c0_44] : memref<2x8x128xf32, #tpu.memory_space<vmem>>, vector<1x8x128xf32>
    %67 = vector.shape_cast %66 : vector<1x8x128xf32> to vector<8x128xf32>
    %68 = arith.mulf %57, %67 : vector<8x128xf32>
    %69 = arith.mulf %51, %59 : vector<8x128xf32>
    %70 = arith.addf %68, %69 : vector<8x128xf32>
    %71 = math.tanh %70 : vector<8x128xf32>
    %72 = arith.mulf %65, %71 : vector<8x128xf32>
    %c0_45 = arith.constant 0 : index
    %c0_46 = arith.constant 0 : index
    %c0_47 = arith.constant 0 : index
    %73 = vector.load %arg6[%c0_45, %c0_46, %c0_47] : memref<2x8x128xf32, #tpu.memory_space<vmem>>, vector<1x8x128xf32>
    %74 = vector.shape_cast %73 : vector<1x8x128xf32> to vector<8x128xf32>
    %75 = vector.shape_cast %72 : vector<8x128xf32> to vector<1x8x128xf32>
    tpu.vector_store %arg6[%c0_45, %c0_46, %c0_47], %75 {strides = array<i32>} : memref<2x8x128xf32, #tpu.memory_space<vmem>>, vector<1x8x128xf32>,
    %c0_48 = arith.constant 0 : index
    %c0_49 = arith.constant 0 : index
    %c0_50 = arith.constant 0 : index
    %76 = vector.load %arg7[%c0_48, %c0_49, %c0_50] : memref<2x8x128xf32, #tpu.memory_space<vmem>>, vector<1x8x128xf32>
    %77 = vector.shape_cast %76 : vector<1x8x128xf32> to vector<8x128xf32>
    %78 = vector.shape_cast %70 : vector<8x128xf32> to vector<1x8x128xf32>
    tpu.vector_store %arg7[%c0_48, %c0_49, %c0_50], %78 {strides = array<i32>} : memref<2x8x128xf32, #tpu.memory_space<vmem>>, vector<1x8x128xf32>,
    %c0_51 = arith.constant 0 : index
    %c0_52 = arith.constant 0 : index
    %79 = vector.load %arg8[%c0_51, %c0_52] : memref<8x256xf32, #tpu.memory_space<vmem>>, vector<8x128xf32>
    tpu.vector_store %arg8[%c0_51, %c0_52], %72 {strides = array<i32>} : memref<8x256xf32, #tpu.memory_space<vmem>>, vector<8x128xf32>,
    %c1_53 = arith.constant 1 : index
    %c0_54 = arith.constant 0 : index
    %c0_55 = arith.constant 0 : index
    %80 = vector.load %arg2[%c1_53, %c0_54, %c0_55] : memref<2x8x128xf32, #tpu.memory_space<vmem>>, vector<1x8x128xf32>
    %81 = vector.shape_cast %80 : vector<1x8x128xf32> to vector<8x128xf32>
    %c0_56 = arith.constant 0 : index
    %c128_57 = arith.constant 128 : index
    %82 = vector.load %arg8[%c0_56, %c128_57] : memref<8x256xf32, #tpu.memory_space<vmem>>, vector<8x128xf32>
    tpu.vector_store %arg8[%c0_56, %c128_57], %81 {strides = array<i32>} : memref<8x256xf32, #tpu.memory_space<vmem>>, vector<8x128xf32>,
    %c0_58 = arith.constant 0 : index
    %c0_59 = arith.constant 0 : index
    %83 = vector.load %arg8[%c0_58, %c0_59] : memref<8x256xf32, #tpu.memory_space<vmem>>, vector<8x256xf32>
    %84 = arith.truncf %83 : vector<8x256xf32> to vector<8x256xbf16>
    %c1_60 = arith.constant 1 : index
    %c0_61 = arith.constant 0 : index
    %c0_62 = arith.constant 0 : index
    %85 = vector.load %arg4[%c1_60, %c0_61, %c0_62] : memref<2x256x512xbf16, #tpu.memory_space<vmem>>, vector<1x256x512xbf16>
    %86 = vector.shape_cast %85 : vector<1x256x512xbf16> to vector<256x512xbf16>
    %cst_63 = arith.constant dense<0.000000e+00> : vector<8x512xf32>
    %87 = tpu.matmul %84, %86, %cst_63 {dimension_numbers = #tpu.dot_dimension_numbers<[1], [0], [0], [1], [0, 0, 1, 1], [], []>} : vector<8x256xbf16>, vector<256x512xbf16>, vector<8x512xf32> -> vector<8x512xf32>
    %c1_64 = arith.constant 1 : index
    %c0_65 = arith.constant 0 : index
    %c0_66 = arith.constant 0 : index
    %88 = vector.load %arg5[%c1_64, %c0_65, %c0_66] : memref<2x1x512xf32, #tpu.memory_space<vmem>>, vector<1x1x512xf32>
    %89 = vector.shape_cast %88 : vector<1x1x512xf32> to vector<1x512xf32>
    %90 = vector.broadcast %89 : vector<1x512xf32> to vector<8x512xf32>
    %91 = arith.addf %87, %90 : vector<8x512xf32>
    %92 = vector.extract_strided_slice %91 {offsets = [0, 0], sizes = [8, 128], strides = [1, 1]} : vector<8x512xf32> to vector<8x128xf32>
    %93 = arith.negf %92 : vector<8x128xf32>
    %94 = math.exp %93 : vector<8x128xf32>
    %cst_67 = arith.constant 1.000000e+00 : f32
    %95 = vector.broadcast %cst_67 : f32 to vector<8x128xf32>
    %96 = arith.addf %95, %94 : vector<8x128xf32>
    %97 = arith.divf %95, %96 : vector<8x128xf32>
    %98 = vector.extract_strided_slice %91 {offsets = [0, 128], sizes = [8, 128], strides = [1, 1]} : vector<8x512xf32> to vector<8x128xf32>
    %99 = arith.negf %98 : vector<8x128xf32>
    %100 = math.exp %99 : vector<8x128xf32>
    %cst_68 = arith.constant 1.000000e+00 : f32
    %101 = vector.broadcast %cst_68 : f32 to vector<8x128xf32>
    %102 = arith.addf %101, %100 : vector<8x128xf32>
    %103 = arith.divf %101, %102 : vector<8x128xf32>
    %104 = vector.extract_strided_slice %91 {offsets = [0, 256], sizes = [8, 128], strides = [1, 1]} : vector<8x512xf32> to vector<8x128xf32>
    %105 = math.tanh %104 : vector<8x128xf32>
    %106 = vector.extract_strided_slice %91 {offsets = [0, 384], sizes = [8, 128], strides = [1, 1]} : vector<8x512xf32> to vector<8x128xf32>
    %107 = arith.negf %106 : vector<8x128xf32>
    %108 = math.exp %107 : vector<8x128xf32>
    %cst_69 = arith.constant 1.000000e+00 : f32
    %109 = vector.broadcast %cst_69 : f32 to vector<8x128xf32>
    %110 = arith.addf %109, %108 : vector<8x128xf32>
    %111 = arith.divf %109, %110 : vector<8x128xf32>
    %c1_70 = arith.constant 1 : index
    %c0_71 = arith.constant 0 : index
    %c0_72 = arith.constant 0 : index
    %112 = vector.load %arg3[%c1_70, %c0_71, %c0_72] : memref<2x8x128xf32, #tpu.memory_space<vmem>>, vector<1x8x128xf32>
    %113 = vector.shape_cast %112 : vector<1x8x128xf32> to vector<8x128xf32>
    %114 = arith.mulf %103, %113 : vector<8x128xf32>
    %115 = arith.mulf %97, %105 : vector<8x128xf32>
    %116 = arith.addf %114, %115 : vector<8x128xf32>
    %117 = math.tanh %116 : vector<8x128xf32>
    %118 = arith.mulf %111, %117 : vector<8x128xf32>
    %c1_73 = arith.constant 1 : index
    %c0_74 = arith.constant 0 : index
    %c0_75 = arith.constant 0 : index
    %119 = vector.load %arg6[%c1_73, %c0_74, %c0_75] : memref<2x8x128xf32, #tpu.memory_space<vmem>>, vector<1x8x128xf32>
    %120 = vector.shape_cast %119 : vector<1x8x128xf32> to vector<8x128xf32>
    %121 = vector.shape_cast %118 : vector<8x128xf32> to vector<1x8x128xf32>
    tpu.vector_store %arg6[%c1_73, %c0_74, %c0_75], %121 {strides = array<i32>} : memref<2x8x128xf32, #tpu.memory_space<vmem>>, vector<1x8x128xf32>,
    %c1_76 = arith.constant 1 : index
    %c0_77 = arith.constant 0 : index
    %c0_78 = arith.constant 0 : index
    %122 = vector.load %arg7[%c1_76, %c0_77, %c0_78] : memref<2x8x128xf32, #tpu.memory_space<vmem>>, vector<1x8x128xf32>
    %123 = vector.shape_cast %122 : vector<1x8x128xf32> to vector<8x128xf32>
    %124 = vector.shape_cast %116 : vector<8x128xf32> to vector<1x8x128xf32>
    tpu.vector_store %arg7[%c1_76, %c0_77, %c0_78], %124 {strides = array<i32>} : memref<2x8x128xf32, #tpu.memory_space<vmem>>, vector<1x8x128xf32>,
    return
  }
}

</mosaic_0001>

<bundles_post_ra>
// kernel: decoder_forward.1
= control target key start
LH: loop header
LB: loop body
LE: loop exit
PB: predicated region body
PF: predicated region fallthrough
CT: control target
= control target key end

     0   :  { %13 = vsyncpa [#allocation5], 0  ;;  %s1751_s0 = inlined_call_operand.vmem [shape: s32[8], index: 0, kind: input, shape index: {}]   ;;  %s1752_s1 = inlined_call_operand.hbm [shape: f32[64,128], index: 1, kind: input, shape index: {}]   ;;  %s1753_s2 = inlined_call_operand.vmem [shape: f32[2,8,128], index: 2, kind: input, shape index: {}, may-alias: {2,6}]   ;;  %s1754_s3 = inlined_call_operand.vmem [shape: f32[2,8,128], index: 3, kind: input, shape index: {}, may-alias: {3,7}]   ;;  %s1755_s4 = inlined_call_operand.hbm [shape: bf16[2,256,512], index: 4, kind: input, shape index: {}]   ;;  %s1756_s5 = inlined_call_operand.vmem [shape: f32[2,1,512], index: 5, kind: input, shape index: {}]   ;;  %s1757_s6 = inlined_call_operand.vmem [shape: f32[2,8,128], index: 6, kind: output, shape index: {0}, may-alias: {2,6}]   ;;  %s1758_s7 = inlined_call_operand.vmem [shape: f32[2,8,128], index: 7, kind: output, shape index: {1}, may-alias: {3,7}]  }
   0x1   :  { %14 = vsyncpa [#allocation4], 0  ;;  %s22_s26 = sshll.u32 %s1751_s0, 4  ;;  %s23_s26 = int_to_ptr.vmem [resolvable:$true] %s22_s26 }
   0x2   :  { %15 = vsyncpa [#allocation8], 0  ;;  %s1546_s27 = scalar_lea.vmem %s23_s26, 16  ;;  %p1551_p1 = scmp.lt.s32.totalorder %s23_s26, %s23_s26 }
   0x3   :  { %p1547_p0 = scmp.ne.s32.totalorder %s23_s26, %s1546_s27  ;;  %p1552_p2 = scmp.lt.s32.totalorder %s1546_s27, %s1546_s27 }
   0x5   :  { %p1553_p3 = por %p1552_p2, %p1551_p1 }
   0x7   :  { %p1554_p4 = pnand %p1553_p3, %p1547_p0 }
   0x9   :  { %1557 = shalt.err (!%p1554_p4)
}
   0xa   :  { %s1608_s28 = smov [#allocation3]   ;;  %s1609_s29 = smov [#allocation6]  }
   0xb   :  { %25 = dma.vmem_to_smem %s23_s26, 16, %s1608_s28, [#allocation5]  }
   0xc   :  { %s31_s30 = sshll.u32 %s1609_s29, 4  ;;  %s1558_s10 = scalar_lea.hbm %s1752_s1, 1024  ;;  %s32_s30 = int_to_ptr.vmem [resolvable:$true] %s31_s30 }
   0xd   :  { %p1559_p5 = scmp.ne.s32.totalorder %s1752_s1, %s1558_s10  ;;  %p1562_p6 = scmp.lt.u32.totalorder %s1558_s10, %s1752_s1 }
   0xf   :  { %p1564_p7 = pnand %p1562_p6, %p1559_p5 }
  0x11   :  { %1567 = shalt.err (!%p1564_p7)
}
  0x12   :  { %s1568_s14 = scalar_lea.vmem %s32_s30, 1024  ;;  %p1573_p9 = scmp.lt.s32.totalorder %s32_s30, %s32_s30 }
  0x13   :  { %p1569_p8 = scmp.ne.s32.totalorder %s32_s30, %s1568_s14  ;;  %p1574_p10 = scmp.lt.s32.totalorder %s1568_s14, %s1568_s14 }
  0x15   :  { %p1575_p11 = por %p1574_p10, %p1573_p9 }
  0x17   :  { %p1576_p12 = pnand %p1575_p11, %p1569_p8 }
  0x19   :  { %1579 = shalt.err (!%p1576_p12)
}
  0x1a   :  { %s1610_s15 = smov 128   ;;  %s1611_s16 = smov 8  }
  0x1b   :  { %37 = dma.hbm_to_vmem [thread:$0]  %s1752_s1, 1024, %s32_s30, [#allocation4], %s1610_s15, %s1610_s15, %s1611_s16  }
  0x1c   :  { %s1612_s19 = smov [#allocation7]   ;;  %s1580_s23 = scalar_lea.hbm %s1755_s4, 16384 }
  0x1d   :  { %s47_s20 = sshll.u32 %s1612_s19, 4  ;;  %p1581_p13 = scmp.ne.s32.totalorder %s1755_s4, %s1580_s23  ;;  %s48_s20 = int_to_ptr.vmem [resolvable:$true] %s47_s20 }
  0x1e   :  { %p1584_p0 = scmp.lt.u32.totalorder %s1580_s23, %s1755_s4 }
  0x20   :  { %p1586_p1 = pnand %p1584_p0, %p1581_p13 }
  0x22   :  { %1589 = shalt.err (!%p1586_p1)
}
  0x23   :  { %s1590_s28 = scalar_lea.vmem %s48_s20, 16384  ;;  %p1595_p3 = scmp.lt.s32.totalorder %s48_s20, %s48_s20 }
  0x24   :  { %p1591_p2 = scmp.ne.s32.totalorder %s48_s20, %s1590_s28  ;;  %p1596_p4 = scmp.lt.s32.totalorder %s1590_s28, %s1590_s28 }
  0x26   :  { %p1597_p5 = por %p1596_p4, %p1595_p3 }
  0x28   :  { %p1598_p6 = pnand %p1597_p5, %p1591_p2 }
  0x2a   :  { %1601 = shalt.err (!%p1598_p6)
}
  0x2b   :  { %s1613_s1 = smov 256   ;;  %s1614_s29 = smov 16  }
  0x2c   :  { %53 = dma.hbm_to_vmem [thread:$0]  %s1755_s4, 16384, %s48_s20, [#allocation8], %s1613_s1, %s1613_s1, %s1614_s29  }
  0x2d   :  { %1602 = dma.done.wait [#allocation5], 16  }
  0x2e   :  { %1603 = vsyncadd [#allocation5], 4294967280 }
  0x2f   :  { %1604 = dma.done.wait [#allocation4], 1024  }
  0x30   :  { %1605 = vsyncadd [#allocation4], 4294966272 }
  0x31   :  { %1606 = dma.done.wait [#allocation8], 16384  }
  0x32   :  { %1607 = vsyncadd [#allocation8], 4294950912 }
  0x33   :  { %65 = sfence }
  0x34   :  { %v1322_v0 = vld [vmem:[#allocation7 + $0x4] ss:$16 sps:$4 sm:$0xff]   ;;  %v1324_v1 = vld [vmem:[#allocation7] ss:$16 sps:$4 sm:$0xff]   ;;  %v1615_v2 = vmov 0.0   ;;  %s1683_s4 = sld [smem:[#allocation3]] }
  0x35   :  { %66 = vst [vmem:[#allocation2] sm:$0xff] %v1615_v2  ;;  %512 = vmatprep.subr.bf16.mxu0 %v1322_v0  ;;  %v1325_v3 = vld [vmem:[#allocation7 + $0x24] ss:$16 sps:$4 sm:$0xff]   ;;  %v1327_v4 = vld [vmem:[#allocation7 + $0x20] ss:$16 sps:$4 sm:$0xff]   ;;  %s1685_s9 = sld [smem:[#allocation3 + $0x1]] }
  0x36   :  { %513 = vmatpush1.bf16.msra.mxu0 %v1324_v1  ;;  %v1328_v5 = vld [vmem:[#allocation7 + $0x44] ss:$16 sps:$4 sm:$0xff]   ;;  %v1333_v6 = vld [vmem:[#allocation7 + $0xc] ss:$16 sps:$4 sm:$0xff]   ;;  %v1336_v7 = vld [vmem:[#allocation7 + $0x8] ss:$16 sps:$4 sm:$0xff]  }
  0x37   :  { %514 = vmatprep.subr.bf16.mxu0 %v1325_v3  ;;  %v1330_v8 = vld [vmem:[#allocation7 + $0x40] ss:$16 sps:$4 sm:$0xff]   ;;  %553 = vmatprep.subr.bf16.mxu1 %v1333_v6  ;;  %v1331_v9 = vld [vmem:[#allocation7 + $0x64] ss:$16 sps:$4 sm:$0xff]   ;;  %v1339_v10 = vld [vmem:[#allocation7 + $0x2c] ss:$16 sps:$4 sm:$0xff]  }
  0x38   :  { %554 = vmatpush1.bf16.msra.mxu1 %v1336_v7  ;;  %v1342_v11 = vld [vmem:[#allocation7 + $0x28] ss:$16 sps:$4 sm:$0xff]   ;;  %v1335_v12 = vld [vmem:[#allocation7 + $0x60] ss:$16 sps:$4 sm:$0xff]   ;;  %v1337_v13 = vld [vmem:[#allocation7 + $0x84] ss:$16 sps:$4 sm:$0xff]  }
  0x39   :  { %555 = vmatprep.subr.bf16.mxu1 %v1339_v10  ;;  %v1345_v14 = vld [vmem:[#allocation7 + $0x4c] ss:$16 sps:$4 sm:$0xff]   ;;  %v1348_v15 = vld [vmem:[#allocation7 + $0x48] ss:$16 sps:$4 sm:$0xff]   ;;  %v1341_v17 = vld [vmem:[#allocation7 + $0x80] ss:$16 sps:$4 sm:$0xff]  }
  0x3a   :  { %515 = vmatpush1.bf16.msra.mxu0 %v1327_v4  ;;  %v1351_v16 = vld [vmem:[#allocation7 + $0x6c] ss:$16 sps:$4 sm:$0xff]   ;;  %v1343_v18 = vld [vmem:[#allocation7 + $0xa4] ss:$16 sps:$4 sm:$0xff]   ;;  %v1354_v19 = vld [vmem:[#allocation7 + $0x68] ss:$16 sps:$4 sm:$0xff]  }
  0x3b   :  { %516 = vmatprep.subr.bf16.mxu0 %v1328_v5  ;;  %v1357_v20 = vld [vmem:[#allocation7 + $0x8c] ss:$16 sps:$4 sm:$0xff]   ;;  %v1347_v21 = vld [vmem:[#allocation7 + $0xa0] ss:$16 sps:$4 sm:$0xff]   ;;  %v1349_v22 = vld [vmem:[#allocation7 + $0xc4] ss:$16 sps:$4 sm:$0xff]  }
  0x3c   :  { %556 = vmatpush1.bf16.msra.mxu1 %v1342_v11  ;;  %v1360_v23 = vld [vmem:[#allocation7 + $0x88] ss:$16 sps:$4 sm:$0xff]   ;;  %v1363_v24 = vld [vmem:[#allocation7 + $0xac] ss:$16 sps:$4 sm:$0xff]   ;;  %v1353_v25 = vld [vmem:[#allocation7 + $0xc0] ss:$16 sps:$4 sm:$0xff]  }
  0x3d   :  { %557 = vmatprep.subr.bf16.mxu1 %v1345_v14  ;;  %v1355_v26 = vld [vmem:[#allocation7 + $0xe4] ss:$16 sps:$4 sm:$0xff]   ;;  %v1366_v27 = vld [vmem:[#allocation7 + $0xa8] ss:$16 sps:$4 sm:$0xff]   ;;  %v1369_v28 = vld [vmem:[#allocation7 + $0xcc] ss:$16 sps:$4 sm:$0xff]  }
  0x3e   :  { %517 = vmatpush1.bf16.msra.mxu0 %v1330_v8  ;;  %s1687_s10 = sld [smem:[#allocation3 + $0x2]]  ;;  %s1689_s11 = sld [smem:[#allocation3 + $0x3]]  ;;  %v1359_v29 = vld [vmem:[#allocation7 + $0xe0] ss:$16 sps:$4 sm:$0xff]   ;;  %v1361_v30 = vld [vmem:[#allocation7 + $0x104] ss:$16 sps:$4 sm:$0xff]  }
  0x3f   :  { %518 = vmatprep.subr.bf16.mxu0 %v1331_v9  ;;  %s1691_s0 = sld [smem:[#allocation3 + $0x4]]  ;;  %v1372_v31 = vld [vmem:[#allocation7 + $0xc8] ss:$16 sps:$4 sm:$0xff]   ;;  %s1693_s12 = sld [smem:[#allocation3 + $0x5]]  ;;  %v1375_v32 = vld [vmem:[#allocation7 + $0xec] ss:$16 sps:$4 sm:$0xff]  }
  0x40   :  { %558 = vmatpush1.bf16.msra.mxu1 %v1348_v15  ;;  %s1695_s13 = sld [smem:[#allocation3 + $0x6]]  ;;  %s1697_s14 = sld [smem:[#allocation3 + $0x7]]  ;;  %v1365_v33 = vld [vmem:[#allocation7 + $0x100] ss:$16 sps:$4 sm:$0xff]   ;;  %v1367_v34 = vld [vmem:[#allocation7 + $0x124] ss:$16 sps:$4 sm:$0xff]  }
  0x41   :  { %559 = vmatprep.subr.bf16.mxu1 %v1351_v16  ;;  %v1378_v35 = vld [vmem:[#allocation7 + $0xe8] ss:$16 sps:$4 sm:$0xff]   ;;  %v1381_v36 = vld [vmem:[#allocation7 + $0x10c] ss:$16 sps:$4 sm:$0xff]   ;;  %v1371_v37 = vld [vmem:[#allocation7 + $0x120] ss:$16 sps:$4 sm:$0xff]  }
  0x42   :  { %519 = vmatpush1.bf16.msra.mxu0 %v1335_v12  ;;  %v1373_v38 = vld [vmem:[#allocation7 + $0x144] ss:$16 sps:$4 sm:$0xff]   ;;  %v1384_v39 = vld [vmem:[#allocation7 + $0x108] ss:$16 sps:$4 sm:$0xff]   ;;  %v1377_v40 = vld [vmem:[#allocation7 + $0x140] ss:$16 sps:$4 sm:$0xff]  }
  0x43   :  { %520 = vmatprep.subr.bf16.mxu0 %v1337_v13  ;;  %v1387_v41 = vld [vmem:[#allocation7 + $0x12c] ss:$16 sps:$4 sm:$0xff]   ;;  %v1379_v42 = vld [vmem:[#allocation7 + $0x164] ss:$16 sps:$4 sm:$0xff]   ;;  %v1390_v43 = vld [vmem:[#allocation7 + $0x128] ss:$16 sps:$4 sm:$0xff]  }
  0x44   :  { %560 = vmatpush1.bf16.msra.mxu1 %v1354_v19  ;;  %s69_s15 = scalar_lea.vmem [#allocation6], %s1683_s4  ;;  %v1393_v45 = vld [vmem:[#allocation7 + $0x14c] ss:$16 sps:$4 sm:$0xff]   ;;  %s73_s16 = scalar_lea.vmem [#allocation6], %s1685_s9  ;;  %v100_v53 = vld [vmem:[%s1753_s2] sm:$0xff] }
  0x45   :  { %561 = vmatprep.subr.bf16.mxu1 %v1357_v20  ;;  %v70_v44 = vld [vmem:[%s69_s15] sm:$0x1]  ;;  %s77_s17 = scalar_lea.vmem [#allocation6], %s1687_s10  ;;  %s81_s18 = scalar_lea.vmem [#allocation6], %s1689_s11  ;;  %v1713_v54 = vld [vmem:[%s1753_s2 + $0x8] sm:$0xff]  ;;  %v105_v55 = vpack.c.bf16 %v100_v53, %v100_v53 }
  0x46   :  { %521 = vmatpush1.bf16.msra.mxu0 %v1341_v17  ;;  %71 = vst [vmem:[#allocation2] sm:$0x1] %v70_v44  ;;  %v74_v46 = vld [vmem:[%s73_s16] sm:$0x1]  ;;  %s85_s19 = scalar_lea.vmem [#allocation6], %s1691_s0  ;;  %s89_s20 = scalar_lea.vmem [#allocation6], %s1693_s12 }
  0x47   :  { %522 = vmatprep.subr.bf16.mxu0 %v1343_v18  ;;  %v78_v47 = vld [vmem:[%s77_s17] sm:$0x1]  ;;  %75 = vst [vmem:[#allocation2 + $0x1] sm:$0x1] %v74_v46  ;;  %s93_s21 = scalar_lea.vmem [#allocation6], %s1695_s13  ;;  %s97_s22 = scalar_lea.vmem [#allocation6], %s1697_s14  ;;  %544 = vmatprep.mubr.bf16.mxu0 %v105_v55 }
  0x48   :  { %562 = vmatpush1.bf16.msra.mxu1 %v1360_v23  ;;  %v82_v48 = vld [vmem:[%s81_s18] sm:$0x1]  ;;  %79 = vst [vmem:[#allocation2 + $0x2] sm:$0x1] %v78_v47  ;;  %v1385_v57 = vld [vmem:[#allocation7 + $0x184] ss:$16 sps:$4 sm:$0xff]   ;;  %585 = vmatprep.mubr.bf16.mxu1 %v105_v55 }
  0x49   :  { %563 = vmatprep.subr.bf16.mxu1 %v1363_v24  ;;  %83 = vst [vmem:[#allocation2 + $0x3] sm:$0x1] %v82_v48  ;;  %v86_v49 = vld [vmem:[%s85_s19] sm:$0x1]  ;;  %v1396_v58 = vld [vmem:[#allocation7 + $0x148] ss:$16 sps:$4 sm:$0xff]  }
  0x4a   :  { %523 = vmatpush1.bf16.msra.mxu0 %v1347_v21  ;;  %v90_v50 = vld [vmem:[%s89_s20] sm:$0x1]  ;;  %87 = vst [vmem:[#allocation2 + $0x4] sm:$0x1] %v86_v49  ;;  %v1399_v59 = vld [vmem:[#allocation7 + $0x16c] ss:$16 sps:$4 sm:$0xff]  }
  0x4b   :  { %524 = vmatprep.subr.bf16.mxu0 %v1349_v22  ;;  %v94_v51 = vld [vmem:[%s93_s21] sm:$0x1]  ;;  %91 = vst [vmem:[#allocation2 + $0x5] sm:$0x1] %v90_v50  ;;  %v1391_v61 = vld [vmem:[#allocation7 + $0x1a4] ss:$16 sps:$4 sm:$0xff]  }
  0x4c   :  { %564 = vmatpush1.bf16.msra.mxu1 %v1366_v27  ;;  %95 = vst [vmem:[#allocation2 + $0x6] sm:$0x1] %v94_v51  ;;  %v98_v52 = vld [vmem:[%s97_s22] sm:$0x1]  ;;  %v1402_v62 = vld [vmem:[#allocation7 + $0x168] ss:$16 sps:$4 sm:$0xff]  }
  0x4d   :  { %565 = vmatprep.subr.bf16.mxu1 %v1369_v28  ;;  %99 = vst [vmem:[#allocation2 + $0x7] sm:$0x1] %v98_v52  ;;  %v1383_v56 = vld [vmem:[#allocation7 + $0x160] ss:$16 sps:$4 sm:$0xff]   ;;  %v1405_v63 = vld [vmem:[#allocation7 + $0x18c] ss:$16 sps:$4 sm:$0xff]  }
  0x4e   :  { %525 = vmatpush1.bf16.msra.mxu0 %v1353_v25  ;;  %v1389_v60 = vld [vmem:[#allocation7 + $0x180] ss:$16 sps:$4 sm:$0xff]   ;;  %v1397_v1 = vld [vmem:[#allocation7 + $0x1c4] ss:$16 sps:$4 sm:$0xff]   ;;  %v1408_v2 = vld [vmem:[#allocation7 + $0x188] ss:$16 sps:$4 sm:$0xff]  }
  0x4f   :  { %526 = vmatprep.subr.bf16.mxu0 %v1355_v26  ;;  %v1395_v0 = vld [vmem:[#allocation7 + $0x1a0] ss:$16 sps:$4 sm:$0xff]   ;;  %v1409_v3 = vld [vmem:[#allocation7 + $0x1ac] ss:$16 sps:$4 sm:$0xff]   ;;  %v1403_v5 = vld [vmem:[#allocation7 + $0x1e4] ss:$16 sps:$4 sm:$0xff]  }
  0x50   :  { %566 = vmatpush1.bf16.msra.mxu1 %v1372_v31  ;;  %v1401_v4 = vld [vmem:[#allocation7 + $0x1c0] ss:$16 sps:$4 sm:$0xff]   ;;  %v1411_v6 = vld [vmem:[#allocation7 + $0x1a8] ss:$16 sps:$4 sm:$0xff]   ;;  %v1412_v7 = vld [vmem:[#allocation7 + $0x1cc] ss:$16 sps:$4 sm:$0xff]  }
  0x51   :  { %567 = vmatprep.subr.bf16.mxu1 %v1375_v32  ;;  %v1407_v8 = vld [vmem:[#allocation7 + $0x1e0] ss:$16 sps:$4 sm:$0xff]   ;;  %v1414_v10 = vld [vmem:[#allocation7 + $0x1c8] ss:$16 sps:$4 sm:$0xff]   ;;  %v1420_v11 = vld [vmem:[#allocation7 + $0x204] ss:$16 sps:$4 sm:$0xff]  }
  0x52   :  { %527 = vmatpush1.bf16.msra.mxu0 %v1359_v29  ;;  %v1415_v12 = vld [vmem:[#allocation7 + $0x1ec] ss:$16 sps:$4 sm:$0xff]   ;;  %v1418_v13 = vld [vmem:[#allocation7 + $0x200] ss:$16 sps:$4 sm:$0xff]   ;;  %v1417_v15 = vld [vmem:[#allocation7 + $0x1e8] ss:$16 sps:$4 sm:$0xff]  }
  0x53   :  { %528 = vmatprep.subr.bf16.mxu0 %v1361_v30  ;;  %v1426_v16 = vld [vmem:[#allocation7 + $0x224] ss:$16 sps:$4 sm:$0xff]   ;;  %v1423_v17 = vld [vmem:[#allocation7 + $0x20c] ss:$16 sps:$4 sm:$0xff]   ;;  %v1424_v18 = vld [vmem:[#allocation7 + $0x220] ss:$16 sps:$4 sm:$0xff]  }
  0x54   :  { %568 = vmatpush1.bf16.msra.mxu1 %v1378_v35  ;;  %v102_v9 = vld [vmem:[#allocation2] sm:$0xff]  ;;  %v1421_v19 = vld [vmem:[#allocation7 + $0x208] ss:$16 sps:$4 sm:$0xff]   ;;  %v1429_v20 = vld [vmem:[#allocation7 + $0x22c] ss:$16 sps:$4 sm:$0xff]  }
  0x55   :  { %569 = vmatprep.subr.bf16.mxu1 %v1381_v36  ;;  %v104_v14 = vpack.c.bf16 %v102_v9, %v102_v9  ;;  %v1427_v21 = vld [vmem:[#allocation7 + $0x228] ss:$16 sps:$4 sm:$0xff]   ;;  %v1432_v22 = vld [vmem:[#allocation7 + $0x244] ss:$16 sps:$4 sm:$0xff]   ;;  %v1435_v23 = vld [vmem:[#allocation7 + $0x24c] ss:$16 sps:$4 sm:$0xff]  }
  0x56   :  { %529 = vmatpush1.bf16.msra.mxu0 %v1365_v33  ;;  %v1430_v24 = vld [vmem:[#allocation7 + $0x240] ss:$16 sps:$4 sm:$0xff]   ;;  %v1433_v25 = vld [vmem:[#allocation7 + $0x248] ss:$16 sps:$4 sm:$0xff]   ;;  %v1438_v26 = vld [vmem:[#allocation7 + $0x264] ss:$16 sps:$4 sm:$0xff]  }
  0x57   :  { %530 = vmatprep.subr.bf16.mxu0 %v1367_v34  ;;  %v1441_v27 = vld [vmem:[#allocation7 + $0x26c] ss:$16 sps:$4 sm:$0xff]   ;;  %v1436_v28 = vld [vmem:[#allocation7 + $0x260] ss:$16 sps:$4 sm:$0xff]   ;;  %v1439_v29 = vld [vmem:[#allocation7 + $0x268] ss:$16 sps:$4 sm:$0xff]  }
  0x58   :  { %570 = vmatpush1.bf16.msra.mxu1 %v1384_v39  ;;  %v1444_v30 = vld [vmem:[#allocation7 + $0x284] ss:$16 sps:$4 sm:$0xff]   ;;  %v1447_v31 = vld [vmem:[#allocation7 + $0x28c] ss:$16 sps:$4 sm:$0xff]   ;;  %v1442_v32 = vld [vmem:[#allocation7 + $0x280] ss:$16 sps:$4 sm:$0xff]  }
  0x59   :  { %571 = vmatprep.subr.bf16.mxu1 %v1387_v41  ;;  %v1445_v33 = vld [vmem:[#allocation7 + $0x288] ss:$16 sps:$4 sm:$0xff]   ;;  %v1450_v34 = vld [vmem:[#allocation7 + $0x2a4] ss:$16 sps:$4 sm:$0xff]   ;;  %v1453_v35 = vld [vmem:[#allocation7 + $0x2ac] ss:$16 sps:$4 sm:$0xff]  }
  0x5a   :  { %531 = vmatpush1.bf16.msra.mxu0 %v1371_v37  ;;  %v1448_v36 = vld [vmem:[#allocation7 + $0x2a0] ss:$16 sps:$4 sm:$0xff]   ;;  %v1451_v37 = vld [vmem:[#allocation7 + $0x2a8] ss:$16 sps:$4 sm:$0xff]   ;;  %v1459_v39 = vld [vmem:[#allocation7 + $0x2cc] ss:$16 sps:$4 sm:$0xff]  }
  0x5b   :  { %532 = vmatprep.subr.bf16.mxu0 %v1373_v38  ;;  %v1456_v38 = vld [vmem:[#allocation7 + $0x2c4] ss:$16 sps:$4 sm:$0xff]   ;;  %v1457_v41 = vld [vmem:[#allocation7 + $0x2c8] ss:$16 sps:$4 sm:$0xff]   ;;  %v1460_v44 = vld [vmem:[#allocation7 + $0x2e0] ss:$16 sps:$4 sm:$0xff]  }
  0x5c   :  { %572 = vmatpush1.bf16.msra.mxu1 %v1390_v43  ;;  %v1465_v43 = vld [vmem:[#allocation7 + $0x2ec] ss:$16 sps:$4 sm:$0xff]   ;;  %v1468_v46 = vld [vmem:[#allocation7 + $0x304] ss:$16 sps:$4 sm:$0xff]   ;;  %v1466_v48 = vld [vmem:[#allocation7 + $0x300] ss:$16 sps:$4 sm:$0xff]  }
  0x5d   :  { %573 = vmatprep.subr.bf16.mxu1 %v1393_v45  ;;  %v1463_v45 = vld [vmem:[#allocation7 + $0x2e8] ss:$16 sps:$4 sm:$0xff]   ;;  %v1471_v47 = vld [vmem:[#allocation7 + $0x30c] ss:$16 sps:$4 sm:$0xff]   ;;  %v1474_v50 = vld [vmem:[#allocation7 + $0x324] ss:$16 sps:$4 sm:$0xff]  }
  0x5e   :  { %533 = vmatpush1.bf16.msra.mxu0 %v1377_v40  ;;  %v1454_v40 = vld [vmem:[#allocation7 + $0x2c0] ss:$16 sps:$4 sm:$0xff]   ;;  %v1469_v49 = vld [vmem:[#allocation7 + $0x308] ss:$16 sps:$4 sm:$0xff]   ;;  %v1477_v51 = vld [vmem:[#allocation7 + $0x32c] ss:$16 sps:$4 sm:$0xff]  }
  0x5f   :  { %534 = vmatprep.subr.bf16.mxu0 %v1379_v42  ;;  %v1462_v42 = vld [vmem:[#allocation7 + $0x2e4] ss:$16 sps:$4 sm:$0xff]   ;;  %v1472_v52 = vld [vmem:[#allocation7 + $0x320] ss:$16 sps:$4 sm:$0xff]   ;;  %v1475_v53 = vld [vmem:[#allocation7 + $0x328] ss:$16 sps:$4 sm:$0xff]  }
  0x60   :  { %574 = vmatpush1.bf16.msra.mxu1 %v1396_v58  ;;  %v1480_v55 = vld [vmem:[#allocation7 + $0x344] ss:$16 sps:$4 sm:$0xff]   ;;  %v1481_v58 = vld [vmem:[#allocation7 + $0x348] ss:$16 sps:$4 sm:$0xff]   ;;  %v1502_v9 = vld [vmem:[#allocation7 + $0x3c0] ss:$16 sps:$4 sm:$0xff]  }
  0x61   :  { %575 = vmatprep.subr.bf16.mxu1 %v1399_v59  ;;  %v1486_v59 = vld [vmem:[#allocation7 + $0x364] ss:$16 sps:$4 sm:$0xff]  }
  0x62   :  { %535 = vmatpush1.bf16.msra.mxu0 %v1383_v56  ;;  %v1483_v56 = vld [vmem:[#allocation7 + $0x34c] ss:$16 sps:$4 sm:$0xff]  }
  0x63   :  { %536 = vmatprep.subr.bf16.mxu0 %v1385_v57  ;;  %v1478_v57 = vld [vmem:[#allocation7 + $0x340] ss:$16 sps:$4 sm:$0xff]  }
  0x64   :  { %576 = vmatpush1.bf16.msra.mxu1 %v1402_v62  ;;  %v1487_v62 = vld [vmem:[#allocation7 + $0x368] ss:$16 sps:$4 sm:$0xff]  }
  0x65   :  { %577 = vmatprep.subr.bf16.mxu1 %v1405_v63  ;;  %v1492_v63 = vld [vmem:[#allocation7 + $0x384] ss:$16 sps:$4 sm:$0xff]  }
  0x66   :  { %537 = vmatpush1.bf16.msra.mxu0 %v1389_v60  ;;  %v1489_v60 = vld [vmem:[#allocation7 + $0x36c] ss:$16 sps:$4 sm:$0xff]  }
  0x67   :  { %538 = vmatprep.subr.bf16.mxu0 %v1391_v61  ;;  %v1484_v61 = vld [vmem:[#allocation7 + $0x360] ss:$16 sps:$4 sm:$0xff]  }
  0x68   :  { %578 = vmatpush1.bf16.msra.mxu1 %v1408_v2  ;;  %v1493_v2 = vld [vmem:[#allocation7 + $0x388] ss:$16 sps:$4 sm:$0xff]  }
  0x69   :  { %579 = vmatprep.subr.bf16.mxu1 %v1409_v3  ;;  %v1498_v3 = vld [vmem:[#allocation7 + $0x3a4] ss:$16 sps:$4 sm:$0xff]  }
  0x6a   :  { %539 = vmatpush1.bf16.msra.mxu0 %v1395_v0  ;;  %v1495_v0 = vld [vmem:[#allocation7 + $0x38c] ss:$16 sps:$4 sm:$0xff]  }
  0x6b   :  { %540 = vmatprep.subr.bf16.mxu0 %v1397_v1  ;;  %v1490_v1 = vld [vmem:[#allocation7 + $0x380] ss:$16 sps:$4 sm:$0xff]  }
  0x6c   :  { %580 = vmatpush1.bf16.msra.mxu1 %v1411_v6  ;;  %v1499_v6 = vld [vmem:[#allocation7 + $0x3a8] ss:$16 sps:$4 sm:$0xff]  }
  0x6d   :  { %581 = vmatprep.subr.bf16.mxu1 %v1412_v7  ;;  %v1504_v7 = vld [vmem:[#allocation7 + $0x3c4] ss:$16 sps:$4 sm:$0xff]  }
  0x6e   :  { %541 = vmatpush1.bf16.msra.mxu0 %v1401_v4  ;;  %v1501_v4 = vld [vmem:[#allocation7 + $0x3ac] ss:$16 sps:$4 sm:$0xff]  }
  0x6f   :  { %542 = vmatprep.subr.bf16.mxu0 %v1403_v5  ;;  %v1496_v5 = vld [vmem:[#allocation7 + $0x3a0] ss:$16 sps:$4 sm:$0xff]  }
  0x70   :  { %582 = vmatpush1.bf16.msra.mxu1 %v1414_v10  ;;  %v1505_v10 = vld [vmem:[#allocation7 + $0x3c8] ss:$16 sps:$4 sm:$0xff]  }
  0x71   :  { %583 = vmatprep.subr.bf16.mxu1 %v1415_v12  ;;  %v1513_v12 = vld [vmem:[#allocation7 + $0x3ec] ss:$16 sps:$4 sm:$0xff]  }
  0x72   :  { %543 = vmatpush1.bf16.msra.mxu0 %v1407_v8  ;;  %v1507_v8 = vld [vmem:[#allocation7 + $0x3cc] ss:$16 sps:$4 sm:$0xff]  }
  0x73   :  { %1037 = vmatprep.subr.bf16.mxu0 %v1420_v11  ;;  %v1510_v11 = vld [vmem:[#allocation7 + $0x3e4] ss:$16 sps:$4 sm:$0xff]  }
  0x74   :  { %584 = vmatpush1.bf16.msra.mxu1 %v1417_v15  ;;  %v628_v15 = vpack.c.bf16 %v1713_v54, %v1713_v54 }
  0x75   :  { %545 = vmatmul.mubr.bf16.vlgmr.msra.gmra.mrb[0].mxu0 %v104_v14  ;;  %1078 = vmatprep.subr.bf16.mxu1 %v1423_v17 }
  0x76   :  { %1038 = vmatpush1.bf16.msra.mxu0 %v1418_v13  ;;  %v1508_v13 = vld [vmem:[#allocation7 + $0x3e0] ss:$16 sps:$4 sm:$0xff]   ;;  %1069 = vmatprep.mubr.bf16.mxu0 %v628_v15 }
  0x77   :  { %1039 = vmatprep.subr.bf16.mxu0 %v1426_v16  ;;  %586 = vmatmul.mubr.bf16.vlgmr.msra.gmra.mrb[0].mxu1 %v104_v14  ;;  %v1511_v14 = vld [vmem:[#allocation7 + $0x3e8] ss:$16 sps:$4 sm:$0xff]   ;;  %v172_v16 = vlaneseq }
  0x78   :  { %1079 = vmatpush1.bf16.msra.mxu1 %v1421_v19  ;;  %1110 = vmatprep.mubr.bf16.mxu1 %v628_v15  ;;  %v170_v19 = vld [vmem:[%s1756_s5] sm:$0xf] }
  0x79   :  { %1080 = vmatprep.subr.bf16.mxu1 %v1429_v20  ;;  %v1717_v17 = vshrl.u32 %v172_v16, 7 }
  0x7a   :  { %1040 = vmatpush1.bf16.msra.mxu0 %v1424_v18 }
  0x7b   :  { %1041 = vmatprep.subr.bf16.mxu0 %v1432_v22  ;;  %v174_v18 = vsub.s32 0, %v1717_v17  ;;  %v178_v20 = vsub.s32 1, %v1717_v17 }
  0x7c   :  { %1081 = vmatpush1.bf16.msra.mxu1 %v1427_v21 }
  0x7d   :  { %1082 = vmatprep.subr.bf16.mxu1 %v1435_v23  ;;  %v175_v21 = vrot.slane %v170_v19, %v174_v18  ;;  %v179_v22 = vrot.slane %v170_v19, %v178_v20  ;;  %v186_v23 = vsub.s32 3, %v1717_v17 }
  0x7e   :  { %1042 = vmatpush1.bf16.msra.mxu0 %v1430_v24 }
  0x7f   :  { %1043 = vmatprep.subr.bf16.mxu0 %v1438_v26 }
  0x80   :  { %1083 = vmatpush1.bf16.msra.mxu1 %v1433_v25 }
  0x81   :  { %1084 = vmatprep.subr.bf16.mxu1 %v1441_v27 }
  0x82   :  { %1044 = vmatpush1.bf16.msra.mxu0 %v1436_v28 }
  0x83   :  { %1045 = vmatprep.subr.bf16.mxu0 %v1444_v30  ;;  %v187_v30 = vrot.slane %v170_v19, %v186_v23 }
  0x84   :  { %1085 = vmatpush1.bf16.msra.mxu1 %v1439_v29 }
  0x85   :  { %1086 = vmatprep.subr.bf16.mxu1 %v1447_v31 }
  0x86   :  { %1046 = vmatpush1.bf16.msra.mxu0 %v1442_v32  ;;  %v182_v32 = vsub.s32 2, %v1717_v17 }
  0x87   :  { %1047 = vmatprep.subr.bf16.mxu0 %v1450_v34 }
  0x88   :  { %1087 = vmatpush1.bf16.msra.mxu1 %v1445_v33 }
  0x89   :  { %1088 = vmatprep.subr.bf16.mxu1 %v1453_v35 }
  0x8a   :  { %1048 = vmatpush1.bf16.msra.mxu0 %v1448_v36 }
  0x8b   :  { %1049 = vmatprep.subr.bf16.mxu0 %v1456_v38 }
  0x8c   :  { %1089 = vmatpush1.bf16.msra.mxu1 %v1451_v37  ;;  %v183_v37 = vrot.slane %v170_v19, %v182_v32 }
  0x8d   :  { %1090 = vmatprep.subr.bf16.mxu1 %v1459_v39 }
  0x8e   :  { %1050 = vmatpush1.bf16.msra.mxu0 %v1454_v40 }
  0x8f   :  { %1051 = vmatprep.subr.bf16.mxu0 %v1462_v42 }
  0x90   :  { %1091 = vmatpush1.bf16.msra.mxu1 %v1457_v41 }
  0x91   :  { %1092 = vmatprep.subr.bf16.mxu1 %v1465_v43 }
  0x92   :  { %1052 = vmatpush1.bf16.msra.mxu0 %v1460_v44 }
  0x93   :  { %1053 = vmatprep.subr.bf16.mxu0 %v1468_v46 }
  0x94   :  { %1093 = vmatpush1.bf16.msra.mxu1 %v1463_v45 }
  0x95   :  { %1094 = vmatprep.subr.bf16.mxu1 %v1471_v47  ;;  %v613_v47 = vld [vmem:[%s1754_s3] sm:$0xff] }
  0x96   :  { %1054 = vmatpush1.bf16.msra.mxu0 %v1466_v48 }
  0x97   :  { %1055 = vmatprep.subr.bf16.mxu0 %v1474_v50 }
  0x98   :  { %1095 = vmatpush1.bf16.msra.mxu1 %v1469_v49 }
  0x99   :  { %1096 = vmatprep.subr.bf16.mxu1 %v1477_v51 }
  0x9a   :  { %1056 = vmatpush1.bf16.msra.mxu0 %v1472_v52 }
  0x9b   :  { %1057 = vmatprep.subr.bf16.mxu0 %v1480_v55 }
  0x9c   :  { %1097 = vmatpush1.bf16.msra.mxu1 %v1475_v53 }
  0x9d   :  { %1098 = vmatprep.subr.bf16.mxu1 %v1483_v56 }
  0x9e   :  { %1058 = vmatpush1.bf16.msra.mxu0 %v1478_v57 }
  0x9f   :  { %1059 = vmatprep.subr.bf16.mxu0 %v1486_v59  ;;  %v1243_v59 = vld [vmem:[%s1756_s5 + $0x4] sm:$0xf] }
  0xa0   :  { %1099 = vmatpush1.bf16.msra.mxu1 %v1481_v58 }
  0xa1   :  { %1100 = vmatprep.subr.bf16.mxu1 %v1489_v60  ;;  %v700_v60 = vrot.slane %v1243_v59, %v174_v18 }
  0xa2   :  { %1060 = vmatpush1.bf16.msra.mxu0 %v1484_v61  ;;  %v704_v61 = vrot.slane %v1243_v59, %v178_v20 }
  0xa3   :  { %1061 = vmatprep.subr.bf16.mxu0 %v1492_v63 }
  0xa4   :  { %1101 = vmatpush1.bf16.msra.mxu1 %v1487_v62 }
  0xa5   :  { %1102 = vmatprep.subr.bf16.mxu1 %v1495_v0 }
  0xa6   :  { %1062 = vmatpush1.bf16.msra.mxu0 %v1490_v1 }
  0xa7   :  { %1063 = vmatprep.subr.bf16.mxu0 %v1498_v3 }
  0xa8   :  { %1103 = vmatpush1.bf16.msra.mxu1 %v1493_v2 }
  0xa9   :  { %1104 = vmatprep.subr.bf16.mxu1 %v1501_v4 }
  0xaa   :  { %1064 = vmatpush1.bf16.msra.mxu0 %v1496_v5 }
  0xab   :  { %1065 = vmatprep.subr.bf16.mxu0 %v1504_v7 }
  0xac   :  { %1105 = vmatpush1.bf16.msra.mxu1 %v1499_v6 }
  0xad   :  { %1106 = vmatprep.subr.bf16.mxu1 %v1507_v8 }
  0xae   :  { %1066 = vmatpush1.bf16.msra.mxu0 %v1502_v9 }
  0xaf   :  { %1067 = vmatprep.subr.bf16.mxu0 %v1510_v11 }
  0xb0   :  { %1107 = vmatpush1.bf16.msra.mxu1 %v1505_v10  ;;  %v712_v10 = vrot.slane %v1243_v59, %v186_v23 }
  0xb1   :  { %1108 = vmatprep.subr.bf16.mxu1 %v1513_v12  ;;  %v708_v12 = vrot.slane %v1243_v59, %v182_v32 }
  0xb2   :  { %1068 = vmatpush1.bf16.msra.mxu0 %v1508_v13 }
  0xb4   :  { %1109 = vmatpush1.bf16.msra.mxu1 %v1511_v14 }
 0x148   :  { %v546_v24 = vpop.f32.mrb[0].mxu0 }
 0x149   :  { %v547_v25 = vadd.f32 %v546_v24, %v175_v21  ;;  %v548_v54 = vpop.f32.mrb[1].mxu0 }
 0x14a   :  { %v549_v26 = vadd.f32 %v548_v54, %v179_v22  ;;  %v550_v27 = vpop.f32.mrb[2].mxu0  ;;  %v587_v33 = vpop.f32.mrb[0].mxu1 }
 0x14b   :  { %v1239_v28 = vmul.f32 -1.442695, %v547_v25  ;;  %v551_v29 = vpop.f32.mrb[3].mxu0  ;;  %v589_v34 = vpop.f32.mrb[1].mxu1  ;;  %v588_v40 = vadd.f32 %v587_v33, %v183_v37 }
 0x14c   :  { %v1240_v31 = vmul.f32 -1.442695, %v549_v26  ;;  %v590_v35 = vadd.f32 %v589_v34, %v187_v30  ;;  %v591_v36 = vpop.f32.mrb[2].mxu1 }
 0x14d   :  { %1514 = vpow2.f32 %v1239_v28  ;;  %v592_v38 = vpop.f32.mrb[3].mxu1 }
 0x14e   :  { %1516 = vpow2.f32 %v1240_v31  ;;  %v1241_v39 = vmul.f32 -1.442695, %v590_v35 }
 0x150   :  { %1518 = vpow2.f32 %v1241_v39 }
 0x151   :  { %1520 = vtanh.f32 %v588_v40 }
 0x157   :  { %v1515_v41 = vpop.eup %1514 }
 0x158   :  { %v1517_v42 = vpop.eup %1516  ;;  %v597_v43 = vadd.f32 1.0, %v1515_v41 }
 0x159   :  { %v603_v44 = vadd.f32 1.0, %v1517_v42 }
 0x15a   :  { %1522 = vrcp.f32 %v597_v43  ;;  %v1519_v45 = vpop.eup %1518 }
 0x15b   :  { %1524 = vrcp.f32 %v603_v44  ;;  %v1521_v46 = vpop.eup %1520  ;;  %v610_v49 = vadd.f32 1.0, %v1519_v45 }
 0x15d   :  { %1526 = vrcp.f32 %v610_v49 }
 0x164   :  { %v1523_v48 = vpop.eup %1522 }
 0x165   :  { %v1525_v50 = vpop.eup %1524  ;;  %v615_v51 = vmul.f32 %v1523_v48, %v1521_v46 }
 0x166   :  { %v614_v52 = vmul.f32 %v1525_v50, %v613_v47 }
 0x167   :  { %v1527_v55 = vpop.eup %1526 }
 0x168   :  { %v616_v53 = vadd.f32 %v615_v51, %v614_v52 }
 0x16a   :  { %1528 = vtanh.f32 %v616_v53  ;;  %620 = vst [vmem:[%s1758_s7] sm:$0xff] %v616_v53 }
 0x171   :  { %v1311_v17 = vld [vmem:[%s1754_s3 + $0x8] sm:$0xff] }
 0x174   :  { %v1529_v56 = vpop.eup %1528 }
 0x175   :  { %v618_v57 = vmul.f32 %v1529_v56, %v1527_v55 }
 0x177   :  { %619 = vst [vmem:[%s1757_s6] sm:$0xff] %v618_v57  ;;  %621 = vst [vmem:[#allocation2] sm:$0xff] %v618_v57  ;;  %v627_v58 = vpack.c.bf16 %v618_v57, %v618_v57 }
 0x179   :  { %1070 = vmatmul.mubr.bf16.vlgmr.msra.gmra.mrb[4].mxu0 %v627_v58  ;;  %1111 = vmatmul.mubr.bf16.vlgmr.msra.gmra.mrb[4].mxu1 %v627_v58 }
 0x24c   :  { %v1071_v62 = vpop.f32.mrb[4].mxu0  ;;  %v1112_v63 = vpop.f32.mrb[4].mxu1 }
 0x24d   :  { %v1072_v0 = vadd.f32 %v1071_v62, %v700_v60  ;;  %v1073_v1 = vpop.f32.mrb[5].mxu0  ;;  %v1114_v2 = vpop.f32.mrb[5].mxu1  ;;  %v1113_v14 = vadd.f32 %v1112_v63, %v708_v12 }
 0x24e   :  { %v1074_v3 = vadd.f32 %v1073_v1, %v704_v61  ;;  %v1075_v4 = vpop.f32.mrb[6].mxu0  ;;  %v1116_v5 = vpop.f32.mrb[6].mxu1  ;;  %v1115_v11 = vadd.f32 %v1114_v2, %v712_v10 }
 0x24f   :  { %v1308_v6 = vmul.f32 -1.442695, %v1072_v0  ;;  %v1076_v7 = vpop.f32.mrb[7].mxu0  ;;  %v1117_v8 = vpop.f32.mrb[7].mxu1 }
 0x250   :  { %v1309_v9 = vmul.f32 -1.442695, %v1074_v3  ;;  %v1310_v13 = vmul.f32 -1.442695, %v1115_v11 }
 0x251   :  { %1530 = vpow2.f32 %v1308_v6 }
 0x252   :  { %1532 = vpow2.f32 %v1309_v9 }
 0x253   :  { %1534 = vpow2.f32 %v1310_v13 }
 0x254   :  { %1536 = vtanh.f32 %v1113_v14 }
 0x25b   :  { %v1531_v15 = vpop.eup %1530 }
 0x25c   :  { %v1533_v16 = vpop.eup %1532  ;;  %v1122_v18 = vadd.f32 1.0, %v1531_v15 }
 0x25d   :  { %v1128_v19 = vadd.f32 1.0, %v1533_v16  ;;  %v1535_v20 = vpop.eup %1534 }
 0x25e   :  { %1538 = vrcp.f32 %v1122_v18  ;;  %v1537_v21 = vpop.eup %1536  ;;  %v1135_v25 = vadd.f32 1.0, %v1535_v20 }
 0x25f   :  { %1540 = vrcp.f32 %v1128_v19 }
 0x260   :  { %1542 = vrcp.f32 %v1135_v25 }
 0x268   :  { %v1539_v22 = vpop.eup %1538 }
 0x269   :  { %v1541_v23 = vpop.eup %1540  ;;  %v1141_v24 = vmul.f32 %v1539_v22, %v1537_v21 }
 0x26a   :  { %v1140_v54 = vmul.f32 %v1541_v23, %v1311_v17  ;;  %v1543_v27 = vpop.eup %1542 }
 0x26c   :  { %v1142_v26 = vadd.f32 %v1141_v24, %v1140_v54 }
 0x26e   :  { %1544 = vtanh.f32 %v1142_v26  ;;  %1313 = vst [vmem:[%s1758_s7 + $0x8] sm:$0xff] %v1142_v26 }
 0x278   :  { %v1545_v28 = vpop.eup %1544 }
 0x279   :  { %v1144_v29 = vmul.f32 %v1545_v28, %v1543_v27 }
 0x27b   :  { %1312 = vst [vmem:[%s1757_s6 + $0x8] sm:$0xff] %v1144_v29 }
 0x27c   :  { %1157 = vsyncpa [#allocation4], 1 }
 0x27d   :  { %1158 = vsyncpa [#allocation8], 1 }
 0x27e   :  { %1159 = vsyncpa [#allocation5], 1 }

</bundles_post_ra>
